<compile_context>
chip_gen: v7x
topology: tpu7x:2x2x1
jax: 0.10.0
libtpu: 0.0.40
codegen_flags: <defaults>
</compile_context>

<pallas_src>
import functools

import jax
import jax.numpy as jnp
from jax.experimental import pallas as pl
from jax.experimental.pallas import tpu as pltpu


def _conv_bn_relu_kernel(a_ref, w_ref, scale_ref, shift_ref, o_ref):
    # a_ref:     (TM, Kp)     im2col patch tile (K zero-padded to 128-multiple)
    # w_ref:     (Kp, Coutp)  reshaped conv weight (zero-padded rows/cols)
    # scale_ref: (1, Coutp)   folded BN scale (zero for padded channels)
    # shift_ref: (1, Coutp)   folded BN shift incl. conv bias (zero-padded)
    # o_ref:     (TM, Coutp)  lane-dense output block
    acc = jnp.dot(a_ref[...], w_ref[...], preferred_element_type=jnp.float32)
    y = acc * scale_ref[...] + shift_ref[...]
    o_ref[...] = jnp.maximum(y, 0.0).astype(o_ref.dtype)


def _round_up(x, n):
    return -(-x // n) * n


def _im2col_nhwc(x_nhwc, kh, kw, stride, padding):
    n, h, w, c = x_nhwc.shape
    xp = jnp.pad(x_nhwc, ((0, 0), (padding, padding), (padding, padding), (0, 0)))
    h_out = (h + 2 * padding - kh) // stride + 1
    w_out = (w + 2 * padding - kw) // stride + 1
    cols = []
    for i in range(kh):
        for j in range(kw):
            cols.append(
                xp[:, i : i + (h_out - 1) * stride + 1 : stride,
                      j : j + (w_out - 1) * stride + 1 : stride, :]
            )
    patches = jnp.concatenate(cols, axis=-1)  # (N, H_out, W_out, KH*KW*Cin)
    return patches.reshape(n * h_out * w_out, kh * kw * c), (n, h_out, w_out)


@functools.partial(jax.jit, static_argnames=("kernel_size", "stride", "padding"))
def conv2d_bn_relu(x_nchw, weight, bias, gamma, beta, running_mean, running_var,
                   *, kernel_size, stride, padding, eps=1e-5):
    cout, cin, kh, kw = weight.shape
    assert kh == kernel_size and kw == kernel_size

    # ---- glue (plain JAX): layout + im2col + BN folding ----
    x_nhwc = jnp.transpose(x_nchw, (0, 2, 3, 1)).astype(jnp.float32)
    a, (n, h_out, w_out) = _im2col_nhwc(x_nhwc, kh, kw, stride, padding)  # (M, K)
    m, k = a.shape

    # weight (Cout, Cin, KH, KW) -> (KH, KW, Cin, Cout) -> (K, Cout)
    w_mat = jnp.transpose(weight, (2, 3, 1, 0)).reshape(k, cout).astype(jnp.float32)

    scale = (gamma / jnp.sqrt(running_var + eps)).astype(jnp.float32)   # (Cout,)
    shift = (beta + scale * (bias - running_mean)).astype(jnp.float32)  # (Cout,)

    # ---- lane/sublane-dense padding (all zero-pads, so results are exact) ----
    k_pad = _round_up(k, 128)        # A lane dim / W sublane dim
    cout_pad = _round_up(cout, 128)  # output lane dim

    a = jnp.pad(a, ((0, 0), (0, k_pad - k)))
    w_mat = jnp.pad(w_mat, ((0, k_pad - k), (0, cout_pad - cout)))
    scale_p = jnp.pad(scale, (0, cout_pad - cout)).reshape(1, cout_pad)
    shift_p = jnp.pad(shift, (0, cout_pad - cout)).reshape(1, cout_pad)

    # Row tile: large tiles amortize per-grid-step overhead, but keep >= 2
    # grid steps when possible so both TensorCores on v7x get work.
    if m <= 128:
        tm = 128
    else:
        tm = min(512, _round_up((m + 1) // 2, 128))
    m_pad = _round_up(m, tm)
    if m_pad != m:
        a = jnp.pad(a, ((0, m_pad - m), (0, 0)))

    cost = pl.CostEstimate(
        flops=2 * m_pad * k_pad * cout_pad,
        transcendentals=0,
        bytes_accessed=4 * (m_pad * k_pad + k_pad * cout_pad
                            + 2 * cout_pad + m_pad * cout_pad),
    )

    # ---- Pallas kernel: fused matmul + BN + ReLU ----
    out = pl.pallas_call(
        _conv_bn_relu_kernel,
        out_shape=jax.ShapeDtypeStruct((m_pad, cout_pad), jnp.float32),
        grid_spec=pltpu.PrefetchScalarGridSpec(
            num_scalar_prefetch=0,
            grid=(m_pad // tm,),
            in_specs=[
                pl.BlockSpec((tm, k_pad), lambda i: (i, 0)),
                pl.BlockSpec((k_pad, cout_pad), lambda i: (0, 0)),
                pl.BlockSpec((1, cout_pad), lambda i: (0, 0)),
                pl.BlockSpec((1, cout_pad), lambda i: (0, 0)),
            ],
            out_specs=pl.BlockSpec((tm, cout_pad), lambda i: (i, 0)),
        ),
        compiler_params=pltpu.CompilerParams(
            dimension_semantics=("parallel",)),
        cost_estimate=cost,
    )(a, w_mat, scale_p, shift_p)

    # Drop padded rows (M) and padded channels (Cout) before returning NCHW.
    out = out[:m, :cout].reshape(n, h_out, w_out, cout)
    return jnp.transpose(out, (0, 3, 1, 2))


def _reference(x_nchw, weight, bias, gamma, beta, running_mean, running_var,
               *, stride, padding, eps=1e-5):
    y = jax.lax.conv_general_dilated(
        x_nchw.astype(jnp.float32), weight.astype(jnp.float32),
        window_strides=(stride, stride),
        padding=[(padding, padding), (padding, padding)],
        dimension_numbers=("NCHW", "OIHW", "NCHW"),
    ) + bias[None, :, None, None]
    y = gamma[None, :, None, None] * (y - running_mean[None, :, None, None]) \
        / jnp.sqrt(running_var[None, :, None, None] + eps) + beta[None, :, None, None]
    return jnp.maximum(y, 0.0)


if __name__ == "__main__":
    # Module config: Conv2d(4, 8, kernel_size=3, stride=1, NL='relu',
    #                       same_padding=True, bn=True, bias=True)
    in_channels, out_channels, kernel_size, stride = 4, 8, 3, 1
    padding = (kernel_size - 1) // 2  # same_padding=True

    key = jax.random.PRNGKey(0)
    kx, kw, kb, kg, kbeta = jax.random.split(key, 5)

    x = jax.random.normal(kx, (2, in_channels, 16, 16), dtype=jnp.float32)
    weight = 0.1 * jax.random.normal(
        kw, (out_channels, in_channels, kernel_size, kernel_size), dtype=jnp.float32)
    bias = 0.1 * jax.random.normal(kb, (out_channels,), dtype=jnp.float32)
    gamma = 1.0 + 0.05 * jax.random.normal(kg, (out_channels,), dtype=jnp.float32)
    beta = 0.05 * jax.random.normal(kbeta, (out_channels,), dtype=jnp.float32)
    running_mean = jnp.zeros((out_channels,), dtype=jnp.float32)
    running_var = jnp.ones((out_channels,), dtype=jnp.float32)

    out = conv2d_bn_relu(
        x, weight, bias, gamma, beta, running_mean, running_var,
        kernel_size=kernel_size, stride=stride, padding=padding)
    out = jax.block_until_ready(out)

    ref = _reference(x, weight, bias, gamma, beta, running_mean, running_var,
                     stride=stride, padding=padding)
    assert out.shape == ref.shape == (2, out_channels, 16, 16)
    assert jnp.allclose(out, ref, atol=1e-4, rtol=1e-4), "mismatch vs reference"

    print("KERNEL_OK")
</pallas_src>

<mosaic_0001>
module attributes {stable_mosaic.version = 11 : i64} {
  func.func @_conv_bn_relu_kernel(%arg0: i32, %arg1: memref<256x128xf32, #tpu.memory_space<vmem>>, %arg2: memref<128x128xf32, #tpu.memory_space<vmem>>, %arg3: memref<1x128xf32, #tpu.memory_space<vmem>>, %arg4: memref<1x128xf32, #tpu.memory_space<vmem>>, %arg5: memref<256x128xf32, #tpu.memory_space<vmem>>) attributes {dimension_semantics = [#tpu.dimension_semantics<parallel>], iteration_bounds = array<i64: 2>, scalar_prefetch = 0 : i64, scratch_operands = 0 : i64, tpu.core_type = #tpu.core_type<tc>, window_params = [{transform_indices = @transform_0, window_bounds = array<i64: 256, 128>}, {pipeline_mode = #tpu.pipeline_mode<synchronous>, transform_indices = @transform_1, window_bounds = array<i64: 128, 128>}, {pipeline_mode = #tpu.pipeline_mode<synchronous>, transform_indices = @transform_2, window_bounds = array<i64: 1, 128>}, {pipeline_mode = #tpu.pipeline_mode<synchronous>, transform_indices = @transform_3, window_bounds = array<i64: 1, 128>}, {transform_indices = @transform_4, window_bounds = array<i64: 256, 128>}]} {
    %c0 = arith.constant 0 : index
    %c0_0 = arith.constant 0 : index
    %0 = vector.load %arg1[%c0, %c0_0] : memref<256x128xf32, #tpu.memory_space<vmem>>, vector<256x128xf32>
    %c0_1 = arith.constant 0 : index
    %c0_2 = arith.constant 0 : index
    %1 = vector.load %arg2[%c0_1, %c0_2] : memref<128x128xf32, #tpu.memory_space<vmem>>, vector<128x128xf32>
    %cst = arith.constant dense<0.000000e+00> : vector<256x128xf32>
    %2 = tpu.matmul %0, %1, %cst {dimension_numbers = #tpu.dot_dimension_numbers<[1], [0], [0], [1], [0, 0, 1, 1], [], []>} : vector<256x128xf32>, vector<128x128xf32>, vector<256x128xf32> -> vector<256x128xf32>
    %c0_3 = arith.constant 0 : index
    %c0_4 = arith.constant 0 : index
    %3 = vector.load %arg3[%c0_3, %c0_4] : memref<1x128xf32, #tpu.memory_space<vmem>>, vector<1x128xf32>
    %4 = vector.broadcast %3 : vector<1x128xf32> to vector<256x128xf32>
    %5 = arith.mulf %2, %4 : vector<256x128xf32>
    %c0_5 = arith.constant 0 : index
    %c0_6 = arith.constant 0 : index
    %6 = vector.load %arg4[%c0_5, %c0_6] : memref<1x128xf32, #tpu.memory_space<vmem>>, vector<1x128xf32>
    %7 = vector.broadcast %6 : vector<1x128xf32> to vector<256x128xf32>
    %8 = arith.addf %5, %7 : vector<256x128xf32>
    %cst_7 = arith.constant 0.000000e+00 : f32
    %9 = vector.broadcast %cst_7 : f32 to vector<256x128xf32>
    %10 = arith.maximumf %8, %9 : vector<256x128xf32>
    %c0_8 = arith.constant 0 : index
    %c0_9 = arith.constant 0 : index
    %11 = vector.load %arg5[%c0_8, %c0_9] : memref<256x128xf32, #tpu.memory_space<vmem>>, vector<256x128xf32>
    tpu.vector_store %arg5[%c0_8, %c0_9], %10 {strides = array<i32>} : memref<256x128xf32, #tpu.memory_space<vmem>>, vector<256x128xf32>,
    return
  }
  func.func @transform_0(%arg0: i32) -> (i32, i32) {
    %c0_i32 = arith.constant 0 : i32
    %c0_i32_0 = arith.constant 0 : i32
    return %arg0, %c0_i32 : i32, i32
  }
  func.func @transform_1(%arg0: i32) -> (i32, i32) {
    %c0_i32 = arith.constant 0 : i32
    %c0_i32_0 = arith.constant 0 : i32
    %c0_i32_1 = arith.constant 0 : i32
    return %c0_i32, %c0_i32_0 : i32, i32
  }
  func.func @transform_2(%arg0: i32) -> (i32, i32) {
    %c0_i32 = arith.constant 0 : i32
    %c0_i32_0 = arith.constant 0 : i32
    %c0_i32_1 = arith.constant 0 : i32
    return %c0_i32, %c0_i32_0 : i32, i32
  }
  func.func @transform_3(%arg0: i32) -> (i32, i32) {
    %c0_i32 = arith.constant 0 : i32
    %c0_i32_0 = arith.constant 0 : i32
    %c0_i32_1 = arith.constant 0 : i32
    return %c0_i32, %c0_i32_0 : i32, i32
  }
  func.func @transform_4(%arg0: i32) -> (i32, i32) {
    %c0_i32 = arith.constant 0 : i32
    %c0_i32_0 = arith.constant 0 : i32
    return %arg0, %c0_i32 : i32, i32
  }
}

</mosaic_0001>

<bundles_post_ra>
// kernel: conv2d_bn_relu.1
= control target key start
LH: loop header
LB: loop body
LE: loop exit
PB: predicated region body
PF: predicated region fallthrough
CT: control target
= control target key end

     0   :  { %s902_s15 = smov 0   ;;  %s1116_s0 = inlined_call_operand.vmem [shape: f32[512,128], index: 0, kind: input, shape index: {}]   ;;  %s1117_s1 = inlined_call_operand.vmem [shape: f32[128,128], index: 1, kind: input, shape index: {}]   ;;  %s1118_s2 = inlined_call_operand.vmem [shape: f32[1,128], index: 2, kind: input, shape index: {}]   ;;  %s1119_s3 = inlined_call_operand.vmem [shape: f32[1,128], index: 3, kind: input, shape index: {}]   ;;  %s1120_s4 = inlined_call_operand.vmem [shape: f32[512,128], index: 4, kind: output, shape index: {}]  }
   0x1 LB: > { %s672_s16 = sadd.s32 4294967295, %s875_s15   ;;  %p676_p0 = scmp.ge.s32.totalorder %s875_s15, 1  ;;  %s875_s15 = sphi %s902_s15, %s14_s15  }
   0x2   : > { %p163_p1 = scmp.lt.s32.totalorder %s875_s15, 3 }
   0x4   : > { %p164_p2 = pnand %p676_p0, %p163_p1 }
   0x5   : > { %v233_v0 = vld [vmem:[%s1117_s1] sm:$0xff] (!%p164_p2)  ;;  %v234_v1 = vld [vmem:[%s1117_s1 + $0x8] sm:$0xff] (!%p164_p2)  ;;  %v235_v2 = vld [vmem:[%s1117_s1 + $0x10] sm:$0xff] (!%p164_p2)  ;;  %s677_s23 = sshll.u32 (!%p164_p2), %s672_s16, 5 }
   0x6   : > { %167 = sbr.rel (%p164_p2) target bundleno = 289 (0x121), region = 36  ;;  %v813_v3 = vpack.c.bf16 (!%p164_p2), %v234_v1, %v233_v0  ;;  %v236_v4 = vld [vmem:[%s1117_s1 + $0x18] sm:$0xff] (!%p164_p2)  ;;  %p190_p3 = scmp.lt.s32.totalorder (!%p164_p2), %s677_s23, 63  ;;  %v237_v6 = vld [vmem:[%s1117_s1 + $0x20] sm:$0xff] (!%p164_p2)  ;;  %v238_v7 = vld [vmem:[%s1117_s1 + $0x28] sm:$0xff] (!%p164_p2) }
   0x7   : > { %v817_v5 = vpack.c.bf16 (!%p164_p2), %v236_v4, %v235_v2  ;;  %v821_v8 = vpack.c.bf16 (!%p164_p2), %v238_v7, %v237_v6  ;;  %v239_v9 = vld [vmem:[%s1117_s1 + $0x30] sm:$0xff] (!%p164_p2)  ;;  %v240_v10 = vld [vmem:[%s1117_s1 + $0x38] sm:$0xff] (!%p164_p2)  ;;  %v241_v14 = vld [vmem:[%s1117_s1 + $0x40] sm:$0xff] (!%p164_p2) }
   0x8   : > { %814 = vmatprep.subr.bf16.mxu0 (!%p164_p2), %v813_v3  ;;  %845 = vmatprep.subr.bf16.mxu1 (!%p164_p2), %v813_v3  ;;  %v825_v13 = vpack.c.bf16 (!%p164_p2), %v240_v10, %v239_v9  ;;  %v242_v15 = vld [vmem:[%s1117_s1 + $0x48] sm:$0xff] (!%p164_p2)  ;;  %v243_v17 = vld [vmem:[%s1117_s1 + $0x50] sm:$0xff] (!%p164_p2)  ;;  %v244_v18 = vld [vmem:[%s1117_s1 + $0x58] sm:$0xff] (!%p164_p2) }
   0x9   : > { %816 = vmatpush3.bf16.msra.mxu0 (!%p164_p2), %v813_v3  ;;  %853 = vmatpush3.bf16.msra.mxu1 (!%p164_p2), %v813_v3  ;;  %v829_v16 = vpack.c.bf16 (!%p164_p2), %v242_v15, %v241_v14  ;;  %v833_v19 = vpack.c.bf16 (!%p164_p2), %v244_v18, %v243_v17  ;;  %v245_v20 = vld [vmem:[%s1117_s1 + $0x60] sm:$0xff] (!%p164_p2)  ;;  %v246_v21 = vld [vmem:[%s1117_s1 + $0x68] sm:$0xff] (!%p164_p2)  ;;  %v247_v23 = vld [vmem:[%s1117_s1 + $0x70] sm:$0xff] (!%p164_p2) }
   0xa   : > { %818 = vmatprep.subr.bf16.mxu0 (!%p164_p2), %v817_v5  ;;  %846 = vmatprep.subr.bf16.mxu1 (!%p164_p2), %v817_v5  ;;  %v837_v22 = vpack.c.bf16 (!%p164_p2), %v246_v21, %v245_v20  ;;  %v248_v24 = vld [vmem:[%s1117_s1 + $0x78] sm:$0xff] (!%p164_p2)  ;;  %v1003_v56 = vld [vmem:[%s1118_s2] ss:$0 sm:$0xff] (!%p164_p2) }
   0xb   : > { %v841_v25 = vpack.c.bf16 (!%p164_p2), %v248_v24, %v247_v23  ;;  %v1008_v58 = vld [vmem:[%s1119_s3] ss:$0 sm:$0xff] (!%p164_p2) }
   0xd   : > { %s1122_s23 = smov (!%p190_p3, %s677_s23), 63  ;;  %820 = vmatpush3.bf16.msra.mxu0 %v817_v5  ;;  %854 = vmatpush3.bf16.msra.mxu1 %v817_v5 }
   0xe   : > { %s678_s30 = sshll.u32 %s1122_s23, 3  ;;  %822 = vmatprep.subr.bf16.mxu0 %v821_v8  ;;  %847 = vmatprep.subr.bf16.mxu1 %v821_v8 }
   0xf   : > { %s942_s11 = scalar_lea.vmem %s1116_s0, %s678_s30 }
  0x10   : > { %v201_v11 = vld [vmem:[%s942_s11] sm:$0xff]  ;;  %v202_v26 = vld [vmem:[%s942_s11 + $0x8] sm:$0xff]  ;;  %v203_v28 = vld [vmem:[%s942_s11 + $0x10] sm:$0xff] }
  0x11   : > { %v217_v12 = vld [vmem:[%s942_s11 + $0x80] sm:$0xff]  ;;  %765 = vmatprep.mubr.f32.mxu0 %v201_v11  ;;  %824 = vmatpush3.bf16.msra.mxu0 %v821_v8  ;;  %v218_v27 = vld [vmem:[%s942_s11 + $0x88] sm:$0xff]  ;;  %v219_v29 = vld [vmem:[%s942_s11 + $0x90] sm:$0xff] }
  0x12   : > { %789 = vmatprep.mubr.f32.mxu1 %v217_v12  ;;  %855 = vmatpush3.bf16.msra.mxu1 %v821_v8  ;;  %v204_v30 = vld [vmem:[%s942_s11 + $0x18] sm:$0xff]  ;;  %v205_v32 = vld [vmem:[%s942_s11 + $0x20] sm:$0xff]  ;;  %v206_v34 = vld [vmem:[%s942_s11 + $0x28] sm:$0xff] }
  0x13   : > { %826 = vmatprep.subr.bf16.mxu0 %v825_v13  ;;  %848 = vmatprep.subr.bf16.mxu1 %v825_v13  ;;  %v220_v31 = vld [vmem:[%s942_s11 + $0x98] sm:$0xff]  ;;  %v221_v33 = vld [vmem:[%s942_s11 + $0xa0] sm:$0xff]  ;;  %v222_v35 = vld [vmem:[%s942_s11 + $0xa8] sm:$0xff] }
  0x14   : > { %v207_v36 = vld [vmem:[%s942_s11 + $0x30] sm:$0xff]  ;;  %v208_v38 = vld [vmem:[%s942_s11 + $0x38] sm:$0xff]  ;;  %v209_v40 = vld [vmem:[%s942_s11 + $0x40] sm:$0xff] }
  0x15   : > { %828 = vmatpush3.bf16.msra.mxu0 %v825_v13  ;;  %v223_v37 = vld [vmem:[%s942_s11 + $0xb0] sm:$0xff]  ;;  %v224_v39 = vld [vmem:[%s942_s11 + $0xb8] sm:$0xff]  ;;  %v225_v41 = vld [vmem:[%s942_s11 + $0xc0] sm:$0xff] }
  0x16   : > { %856 = vmatpush3.bf16.msra.mxu1 %v825_v13  ;;  %830 = vmatprep.subr.bf16.mxu0 %v829_v16  ;;  %v210_v42 = vld [vmem:[%s942_s11 + $0x48] sm:$0xff]  ;;  %v211_v44 = vld [vmem:[%s942_s11 + $0x50] sm:$0xff]  ;;  %v212_v46 = vld [vmem:[%s942_s11 + $0x58] sm:$0xff] }
  0x17   : > { %849 = vmatprep.subr.bf16.mxu1 %v829_v16  ;;  %v226_v43 = vld [vmem:[%s942_s11 + $0xc8] sm:$0xff]  ;;  %v227_v45 = vld [vmem:[%s942_s11 + $0xd0] sm:$0xff]  ;;  %v228_v47 = vld [vmem:[%s942_s11 + $0xd8] sm:$0xff] }
  0x18   : > { %v213_v48 = vld [vmem:[%s942_s11 + $0x60] sm:$0xff]  ;;  %v214_v50 = vld [vmem:[%s942_s11 + $0x68] sm:$0xff]  ;;  %v215_v52 = vld [vmem:[%s942_s11 + $0x70] sm:$0xff] }
  0x19   : > { %832 = vmatpush3.bf16.msra.mxu0 %v829_v16  ;;  %v229_v49 = vld [vmem:[%s942_s11 + $0xe0] sm:$0xff]  ;;  %v230_v51 = vld [vmem:[%s942_s11 + $0xe8] sm:$0xff]  ;;  %v231_v53 = vld [vmem:[%s942_s11 + $0xf0] sm:$0xff] }
  0x1a   : > { %857 = vmatpush3.bf16.msra.mxu1 %v829_v16  ;;  %834 = vmatprep.subr.bf16.mxu0 %v833_v19  ;;  %v216_v54 = vld [vmem:[%s942_s11 + $0x78] sm:$0xff] }
  0x1b   : > { %850 = vmatprep.subr.bf16.mxu1 %v833_v19  ;;  %v232_v55 = vld [vmem:[%s942_s11 + $0xf8] sm:$0xff]  ;;  %s1021_s11 = scalar_lea.vmem %s1120_s4, %s678_s30 }
  0x1d   : > { %836 = vmatpush3.bf16.msra.mxu0 %v833_v19 }
  0x1e   : > { %858 = vmatpush3.bf16.msra.mxu1 %v833_v19  ;;  %838 = vmatprep.subr.bf16.mxu0 %v837_v22 }
  0x1f   : > { %851 = vmatprep.subr.bf16.mxu1 %v837_v22 }
  0x21   : > { %840 = vmatpush3.bf16.msra.mxu0 %v837_v22 }
  0x22   : > { %859 = vmatpush3.bf16.msra.mxu1 %v837_v22  ;;  %842 = vmatprep.subr.bf16.mxu0 %v841_v25 }
  0x23   : > { %852 = vmatprep.subr.bf16.mxu1 %v841_v25 }
  0x25   : > { %844 = vmatpush3.bf16.msra.mxu0 %v841_v25 }
  0x26   : > { %860 = vmatpush3.bf16.msra.mxu1 %v841_v25 }
  0x28   : > { %766 = vmatmul.mubr.f32.vlgmr.msra.gmra.mrb[0].mxu0 %v202_v26 }
  0x29   : > { %790 = vmatmul.mubr.f32.vlgmr.msra.gmra.mrb[0].mxu1 %v218_v27  ;;  %768 = vmatprep.mubr.f32.mxu0 %v203_v28 }
  0x2a   : > { %792 = vmatprep.mubr.f32.mxu1 %v219_v29 }
  0x2c   : > { %769 = vmatmul.mubr.f32.gmra.mrb[2].mxu0 %v204_v30 }
  0x2d   : > { %793 = vmatmul.mubr.f32.gmra.mrb[2].mxu1 %v220_v31  ;;  %771 = vmatprep.mubr.f32.mxu0 %v205_v32 }
  0x2e   : > { %795 = vmatprep.mubr.f32.mxu1 %v221_v33 }
  0x30   : > { %772 = vmatmul.mubr.f32.gmra.mrb[4].mxu0 %v206_v34 }
  0x31   : > { %796 = vmatmul.mubr.f32.gmra.mrb[4].mxu1 %v222_v35  ;;  %774 = vmatprep.mubr.f32.mxu0 %v207_v36 }
  0x32   : > { %798 = vmatprep.mubr.f32.mxu1 %v223_v37 }
  0x34   : > { %775 = vmatmul.mubr.f32.gmra.mrb[6].mxu0 %v208_v38 }
  0x35   : > { %799 = vmatmul.mubr.f32.gmra.mrb[6].mxu1 %v224_v39  ;;  %777 = vmatprep.mubr.f32.mxu0 %v209_v40 }
  0x36   : > { %801 = vmatprep.mubr.f32.mxu1 %v225_v41 }
  0x38   : > { %778 = vmatmul.mubr.f32.gmra.mrb[8].mxu0 %v210_v42 }
  0x39   : > { %802 = vmatmul.mubr.f32.gmra.mrb[8].mxu1 %v226_v43  ;;  %780 = vmatprep.mubr.f32.mxu0 %v211_v44 }
  0x3a   : > { %804 = vmatprep.mubr.f32.mxu1 %v227_v45 }
  0x3c   : > { %781 = vmatmul.mubr.f32.gmra.mrb[10].mxu0 %v212_v46 }
  0x3d   : > { %805 = vmatmul.mubr.f32.gmra.mrb[10].mxu1 %v228_v47  ;;  %783 = vmatprep.mubr.f32.mxu0 %v213_v48 }
  0x3e   : > { %807 = vmatprep.mubr.f32.mxu1 %v229_v49 }
  0x40   : > { %784 = vmatmul.mubr.f32.gmra.mrb[12].mxu0 %v214_v50 }
  0x41   : > { %808 = vmatmul.mubr.f32.gmra.mrb[12].mxu1 %v230_v51  ;;  %786 = vmatprep.mubr.f32.mxu0 %v215_v52 }
  0x42   : > { %810 = vmatprep.mubr.f32.mxu1 %v231_v53 }
  0x44   : > { %787 = vmatmul.mubr.f32.gmra.mrb[14].mxu0 %v216_v54 }
  0x45   : > { %811 = vmatmul.mubr.f32.gmra.mrb[14].mxu1 %v232_v55 }
  0xfb   : > { %v767_v57 = vpop.f32.mrb[0].mxu0 }
  0xfc   : > { %v791_v59 = vpop.f32.mrb[0].mxu1  ;;  %v482_v60 = vmul.f32 %v767_v57, %v1003_v56  ;;  %v315_v62 = vpop.f32.mrb[1].mxu0 }
  0xfd   : > { %v498_v61 = vmul.f32 %v791_v59, %v1003_v56  ;;  %v395_v63 = vpop.f32.mrb[1].mxu1  ;;  %v481_v0 = vmul.f32 %v1003_v56, %v315_v62 }
  0xfe   : > { %v497_v1 = vmul.f32 %v1003_v56, %v395_v63  ;;  %v521_v2 = vadd.f32 %v1008_v58, %v482_v60 }
  0xff   : > { %v537_v3 = vadd.f32 %v1008_v58, %v498_v61  ;;  %v520_v4 = vadd.f32 %v1008_v58, %v481_v0  ;;  %v770_v6 = vpop.f32.mrb[2].mxu0 }
 0x100   : > { %v536_v5 = vadd.f32 %v1008_v58, %v497_v1  ;;  %v794_v7 = vpop.f32.mrb[2].mxu1  ;;  %v553_v8 = vmax.f32 %v521_v2, 0.0  ;;  %v484_v10 = vmul.f32 %v770_v6, %v1003_v56  ;;  %v325_v12 = vpop.f32.mrb[3].mxu0 }
 0x101   : > { %v569_v9 = vmax.f32 %v537_v3, 0.0  ;;  %v500_v11 = vmul.f32 %v794_v7, %v1003_v56  ;;  %v405_v13 = vpop.f32.mrb[3].mxu1  ;;  %v552_v14 = vmax.f32 %v520_v4, 0.0  ;;  %v483_v16 = vmul.f32 %v1003_v56, %v325_v12 }
 0x102   : > { %v568_v15 = vmax.f32 %v536_v5, 0.0  ;;  %v499_v17 = vmul.f32 %v1003_v56, %v405_v13  ;;  %585 = vst [vmem:[%s1021_s11 + $0x8] sm:$0xff] %v553_v8  ;;  %v523_v18 = vadd.f32 %v1008_v58, %v484_v10 }
 0x103   : > { %601 = vst [vmem:[%s1021_s11 + $0x88] sm:$0xff] %v569_v9  ;;  %v539_v19 = vadd.f32 %v1008_v58, %v500_v11  ;;  %584 = vst [vmem:[%s1021_s11] sm:$0xff] %v552_v14  ;;  %v522_v20 = vadd.f32 %v1008_v58, %v483_v16  ;;  %v773_v22 = vpop.f32.mrb[4].mxu0 }
 0x104   : > { %600 = vst [vmem:[%s1021_s11 + $0x80] sm:$0xff] %v568_v15  ;;  %v538_v21 = vadd.f32 %v1008_v58, %v499_v17  ;;  %v797_v23 = vpop.f32.mrb[4].mxu1  ;;  %v555_v24 = vmax.f32 %v523_v18, 0.0  ;;  %v486_v26 = vmul.f32 %v773_v22, %v1003_v56  ;;  %v335_v28 = vpop.f32.mrb[5].mxu0 }
 0x105   : > { %v571_v25 = vmax.f32 %v539_v19, 0.0  ;;  %v502_v27 = vmul.f32 %v797_v23, %v1003_v56  ;;  %v415_v29 = vpop.f32.mrb[5].mxu1  ;;  %v554_v30 = vmax.f32 %v522_v20, 0.0  ;;  %v485_v32 = vmul.f32 %v1003_v56, %v335_v28 }
 0x106   : > { %v570_v31 = vmax.f32 %v538_v21, 0.0  ;;  %v501_v33 = vmul.f32 %v1003_v56, %v415_v29  ;;  %587 = vst [vmem:[%s1021_s11 + $0x18] sm:$0xff] %v555_v24  ;;  %v525_v34 = vadd.f32 %v1008_v58, %v486_v26 }
 0x107   : > { %603 = vst [vmem:[%s1021_s11 + $0x98] sm:$0xff] %v571_v25  ;;  %v541_v35 = vadd.f32 %v1008_v58, %v502_v27  ;;  %586 = vst [vmem:[%s1021_s11 + $0x10] sm:$0xff] %v554_v30  ;;  %v524_v36 = vadd.f32 %v1008_v58, %v485_v32  ;;  %v776_v38 = vpop.f32.mrb[6].mxu0 }
 0x108   : > { %602 = vst [vmem:[%s1021_s11 + $0x90] sm:$0xff] %v570_v31  ;;  %v540_v37 = vadd.f32 %v1008_v58, %v501_v33  ;;  %v800_v39 = vpop.f32.mrb[6].mxu1  ;;  %v557_v40 = vmax.f32 %v525_v34, 0.0  ;;  %v488_v42 = vmul.f32 %v776_v38, %v1003_v56  ;;  %v345_v44 = vpop.f32.mrb[7].mxu0 }
 0x109   : > { %v573_v41 = vmax.f32 %v541_v35, 0.0  ;;  %v504_v43 = vmul.f32 %v800_v39, %v1003_v56  ;;  %v425_v45 = vpop.f32.mrb[7].mxu1  ;;  %v556_v46 = vmax.f32 %v524_v36, 0.0  ;;  %v487_v48 = vmul.f32 %v1003_v56, %v345_v44 }
 0x10a   : > { %v572_v47 = vmax.f32 %v540_v37, 0.0  ;;  %v503_v49 = vmul.f32 %v1003_v56, %v425_v45  ;;  %589 = vst [vmem:[%s1021_s11 + $0x28] sm:$0xff] %v557_v40  ;;  %v527_v50 = vadd.f32 %v1008_v58, %v488_v42 }
 0x10b   : > { %605 = vst [vmem:[%s1021_s11 + $0xa8] sm:$0xff] %v573_v41  ;;  %v543_v51 = vadd.f32 %v1008_v58, %v504_v43  ;;  %588 = vst [vmem:[%s1021_s11 + $0x20] sm:$0xff] %v556_v46  ;;  %v526_v52 = vadd.f32 %v1008_v58, %v487_v48  ;;  %v779_v54 = vpop.f32.mrb[8].mxu0 }
 0x10c   : > { %604 = vst [vmem:[%s1021_s11 + $0xa0] sm:$0xff] %v572_v47  ;;  %v542_v53 = vadd.f32 %v1008_v58, %v503_v49  ;;  %v803_v55 = vpop.f32.mrb[8].mxu1  ;;  %v559_v57 = vmax.f32 %v527_v50, 0.0  ;;  %v490_v60 = vmul.f32 %v779_v54, %v1003_v56  ;;  %v355_v62 = vpop.f32.mrb[9].mxu0 }
 0x10d   : > { %v575_v59 = vmax.f32 %v543_v51, 0.0  ;;  %v506_v61 = vmul.f32 %v803_v55, %v1003_v56  ;;  %v435_v63 = vpop.f32.mrb[9].mxu1  ;;  %v558_v0 = vmax.f32 %v526_v52, 0.0  ;;  %v489_v2 = vmul.f32 %v1003_v56, %v355_v62 }
 0x10e   : > { %v574_v1 = vmax.f32 %v542_v53, 0.0  ;;  %v505_v3 = vmul.f32 %v1003_v56, %v435_v63  ;;  %591 = vst [vmem:[%s1021_s11 + $0x38] sm:$0xff] %v559_v57  ;;  %v529_v4 = vadd.f32 %v1008_v58, %v490_v60 }
 0x10f   : > { %607 = vst [vmem:[%s1021_s11 + $0xb8] sm:$0xff] %v575_v59  ;;  %v545_v5 = vadd.f32 %v1008_v58, %v506_v61  ;;  %590 = vst [vmem:[%s1021_s11 + $0x30] sm:$0xff] %v558_v0  ;;  %v528_v6 = vadd.f32 %v1008_v58, %v489_v2  ;;  %v782_v8 = vpop.f32.mrb[10].mxu0 }
 0x110   : > { %606 = vst [vmem:[%s1021_s11 + $0xb0] sm:$0xff] %v574_v1  ;;  %v544_v7 = vadd.f32 %v1008_v58, %v505_v3  ;;  %v806_v9 = vpop.f32.mrb[10].mxu1  ;;  %v561_v10 = vmax.f32 %v529_v4, 0.0  ;;  %v492_v12 = vmul.f32 %v782_v8, %v1003_v56  ;;  %v365_v14 = vpop.f32.mrb[11].mxu0 }
 0x111   : > { %v577_v11 = vmax.f32 %v545_v5, 0.0  ;;  %v508_v13 = vmul.f32 %v806_v9, %v1003_v56  ;;  %v445_v15 = vpop.f32.mrb[11].mxu1  ;;  %v560_v16 = vmax.f32 %v528_v6, 0.0  ;;  %v491_v18 = vmul.f32 %v1003_v56, %v365_v14 }
 0x112   : > { %v576_v17 = vmax.f32 %v544_v7, 0.0  ;;  %v507_v19 = vmul.f32 %v1003_v56, %v445_v15  ;;  %593 = vst [vmem:[%s1021_s11 + $0x48] sm:$0xff] %v561_v10  ;;  %v531_v20 = vadd.f32 %v1008_v58, %v492_v12 }
 0x113   : > { %609 = vst [vmem:[%s1021_s11 + $0xc8] sm:$0xff] %v577_v11  ;;  %v547_v21 = vadd.f32 %v1008_v58, %v508_v13  ;;  %592 = vst [vmem:[%s1021_s11 + $0x40] sm:$0xff] %v560_v16  ;;  %v530_v22 = vadd.f32 %v1008_v58, %v491_v18  ;;  %v785_v24 = vpop.f32.mrb[12].mxu0 }
 0x114   : > { %608 = vst [vmem:[%s1021_s11 + $0xc0] sm:$0xff] %v576_v17  ;;  %v546_v23 = vadd.f32 %v1008_v58, %v507_v19  ;;  %v809_v25 = vpop.f32.mrb[12].mxu1  ;;  %v563_v26 = vmax.f32 %v531_v20, 0.0  ;;  %v494_v28 = vmul.f32 %v785_v24, %v1003_v56  ;;  %v375_v30 = vpop.f32.mrb[13].mxu0 }
 0x115   : > { %v579_v27 = vmax.f32 %v547_v21, 0.0  ;;  %v510_v29 = vmul.f32 %v809_v25, %v1003_v56  ;;  %v455_v31 = vpop.f32.mrb[13].mxu1  ;;  %v562_v32 = vmax.f32 %v530_v22, 0.0  ;;  %v493_v34 = vmul.f32 %v1003_v56, %v375_v30 }
 0x116   : > { %v578_v33 = vmax.f32 %v546_v23, 0.0  ;;  %v509_v35 = vmul.f32 %v1003_v56, %v455_v31  ;;  %595 = vst [vmem:[%s1021_s11 + $0x58] sm:$0xff] %v563_v26  ;;  %v533_v36 = vadd.f32 %v1008_v58, %v494_v28 }
 0x117   : > { %611 = vst [vmem:[%s1021_s11 + $0xd8] sm:$0xff] %v579_v27  ;;  %v549_v37 = vadd.f32 %v1008_v58, %v510_v29  ;;  %594 = vst [vmem:[%s1021_s11 + $0x50] sm:$0xff] %v562_v32  ;;  %v532_v38 = vadd.f32 %v1008_v58, %v493_v34  ;;  %v788_v40 = vpop.f32.mrb[14].mxu0 }
 0x118   : > { %610 = vst [vmem:[%s1021_s11 + $0xd0] sm:$0xff] %v578_v33  ;;  %v548_v39 = vadd.f32 %v1008_v58, %v509_v35  ;;  %v812_v41 = vpop.f32.mrb[14].mxu1  ;;  %v565_v42 = vmax.f32 %v533_v36, 0.0  ;;  %v496_v44 = vmul.f32 %v788_v40, %v1003_v56  ;;  %v385_v46 = vpop.f32.mrb[15].mxu0 }
 0x119   : > { %v581_v43 = vmax.f32 %v549_v37, 0.0  ;;  %v512_v45 = vmul.f32 %v812_v41, %v1003_v56  ;;  %v465_v47 = vpop.f32.mrb[15].mxu1  ;;  %v564_v48 = vmax.f32 %v532_v38, 0.0  ;;  %v495_v50 = vmul.f32 %v1003_v56, %v385_v46 }
 0x11a   : > { %v580_v49 = vmax.f32 %v548_v39, 0.0  ;;  %v511_v51 = vmul.f32 %v1003_v56, %v465_v47  ;;  %597 = vst [vmem:[%s1021_s11 + $0x68] sm:$0xff] %v565_v42  ;;  %v535_v52 = vadd.f32 %v1008_v58, %v496_v44 }
 0x11b   : > { %613 = vst [vmem:[%s1021_s11 + $0xe8] sm:$0xff] %v581_v43  ;;  %v551_v53 = vadd.f32 %v1008_v58, %v512_v45  ;;  %596 = vst [vmem:[%s1021_s11 + $0x60] sm:$0xff] %v564_v48  ;;  %v534_v54 = vadd.f32 %v1008_v58, %v495_v50 }
 0x11c   : > { %612 = vst [vmem:[%s1021_s11 + $0xe0] sm:$0xff] %v580_v49  ;;  %v550_v55 = vadd.f32 %v1008_v58, %v511_v51  ;;  %v567_v57 = vmax.f32 %v535_v52, 0.0 }
 0x11d   : > { %v583_v59 = vmax.f32 %v551_v53, 0.0  ;;  %v566_v60 = vmax.f32 %v534_v54, 0.0 }
 0x11e   : > { %v582_v61 = vmax.f32 %v550_v55, 0.0  ;;  %599 = vst [vmem:[%s1021_s11 + $0x78] sm:$0xff] %v567_v57 }
 0x11f   : > { %615 = vst [vmem:[%s1021_s11 + $0xf8] sm:$0xff] %v583_v59  ;;  %598 = vst [vmem:[%s1021_s11 + $0x70] sm:$0xff] %v566_v60 }
 0x120   : > { %614 = vst [vmem:[%s1021_s11 + $0xf0] sm:$0xff] %v582_v61 }
 0x121 PF: > { %s14_s15 = sadd.s32 1, %s875_s15  }
 0x122   : > { %p11_p4 = scmp.ge.s32.totalorder %s14_s15, 4  }
 0x124   :  { %13 = sbr.rel (!%p11_p4) target bundleno = 1 (0x1), region = 66 }

</bundles_post_ra>
